<compile_context>
chip_gen: v5e
topology: v5e:2x2
jax: 0.10.0
libtpu: 0.0.40
codegen_flags: <defaults>
</compile_context>

<pallas_src>
import jax
import jax.numpy as jnp
from jax import lax  # noqa: F401  (kept for parity / future use)
from jax.experimental import pallas as pl
from jax.experimental.pallas import tpu as pltpu  # noqa: F401


def _bilstm_kernel(embbi_ref,   # (S, 2E) f32: [emb[t] | emb[S-1-t]]
                   wx_ref,      # (2E, 8H) fused input-projection weights
                   bx_ref,      # (1, 8H)  fused biases (b_ih + b_hh, both dirs)
                   whh_ref,     # (2H, 8H) block-diagonal fused recurrent weights
                   wlin_ref,    # (2H, L)  classifier weights (rows in [h_f|h_b] order)
                   blin_ref,    # (1, L)
                   out_ref):    # (1, L)   log-probs
    S = embbi_ref.shape[0]
    H2 = whh_ref.shape[0]        # 2H (== E)
    H6 = 3 * H2                  # 6H: sigmoid block width

    # ---- prologue: all input-side gate pre-activations, both directions ----
    # (S, 2E) @ (2E, 8H) -> (S, 8H); lane dim 8H = 128 is MXU/vreg native.
    gates_x = (jnp.dot(embbi_ref[...], wx_ref[...],
                       preferred_element_type=jnp.float32)
               + bx_ref[...])

    # ---- fused bidirectional recurrence, state carried in vregs ----
    h = jnp.zeros((1, H2), jnp.float32)   # [h_f | h_b]
    c = jnp.zeros((1, H2), jnp.float32)   # [c_f | c_b]

    # Fully unrolled: S is a small static trip count, so the scheduler sees
    # the whole dependency chain and all slices are static.
    for t in range(S):
        gates = (jnp.dot(h, whh_ref[...],
                         preferred_element_type=jnp.float32)
                 + gates_x[t:t + 1, :])                    # (1, 8H)
        # fused gate layout: [i_f, i_b, f_f, f_b, o_f, o_b, g_f, g_b]
        sig = jax.nn.sigmoid(gates[:, :H6])                # one EUP region (6H lanes)
        g_g = jnp.tanh(gates[:, H6:])                      # (1, 2H) = [g_f | g_b]
        i_g = sig[:, 0:H2]                                 # [i_f | i_b]
        f_g = sig[:, H2:2 * H2]                            # [f_f | f_b]
        o_g = sig[:, 2 * H2:3 * H2]                        # [o_f | o_b]
        c = f_g * c + i_g * g_g
        h = o_g * jnp.tanh(c)

    # After S steps: h = [h_f_final | h_b_final].  The torch concat
    # (h_b_final, h_f_final) is folded into a row permutation of wlin.
    logits = (jnp.dot(h, wlin_ref[...], preferred_element_type=jnp.float32)
              + blin_ref[...])                             # (1, L)

    # numerically-stable log_softmax
    m = jnp.max(logits, axis=-1, keepdims=True)
    z = logits - m
    lse = jnp.log(jnp.sum(jnp.exp(z), axis=-1, keepdims=True))
    out_ref[...] = z - lse


def _fuse_gate_cols(w_f, w_b):
    """Scatter PyTorch-order [i, f, g, o] gate blocks of the forward (w_f) and
    backward (w_b) direction into the fused column layout
    [i_f, i_b, f_f, f_b, o_f, o_b, g_f, g_b] along the last axis."""
    i_f, f_f, g_f, o_f = jnp.split(w_f, 4, axis=-1)
    i_b, f_b, g_b, o_b = jnp.split(w_b, 4, axis=-1)
    return jnp.concatenate([i_f, i_b, f_f, f_b, o_f, o_b, g_f, g_b], axis=-1)


def bilstm_classifier_forward(x, params):
    """x: (1, S) int32 token ids. Returns (1, label_size) f32 log-probs."""
    emb_table = params["embedding"]                      # (V, E)
    emb = emb_table[x[0]].astype(jnp.float32)            # (S, E)  (glue gather)

    S, E = emb.shape
    H = E // 2
    L = params["b_lin"].shape[-1]

    # Forward direction consumes emb[t]; backward consumes emb[S-1-t].
    # Stack them side by side so a single (S, 2E) @ (2E, 8H) matmul produces
    # every timestep's input gates for both directions.
    emb_bi = jnp.concatenate([emb, emb[::-1]], axis=1)   # (S, 2E)

    zE = jnp.zeros((E, 4 * H), jnp.float32)
    wx = _fuse_gate_cols(
        jnp.concatenate([params["w_ih_f"].T, zE], axis=0),   # rows 0:E  -> fwd
        jnp.concatenate([zE, params["w_ih_b"].T], axis=0))   # rows E:2E -> bwd
    bx = _fuse_gate_cols(
        (params["b_ih_f"] + params["b_hh_f"])[None, :],
        (params["b_ih_b"] + params["b_hh_b"])[None, :])      # (1, 8H)

    zH = jnp.zeros((H, 4 * H), jnp.float32)
    whh = _fuse_gate_cols(
        jnp.concatenate([params["w_hh_f"].T, zH], axis=0),   # rows 0:H  -> h_f
        jnp.concatenate([zH, params["w_hh_b"].T], axis=0))   # rows H:2H -> h_b

    # torch feat = [h_b_final | h_f_final]; our h = [h_f | h_b]  ->  permute rows.
    wlin_t = params["w_lin"].T                               # (E, L)
    wlin = jnp.concatenate([wlin_t[H:], wlin_t[:H]], axis=0) # (2H, L)
    blin = params["b_lin"].reshape(1, L)

    # No grid, no scratch: whole-array operands, single invocation.
    return pl.pallas_call(
        _bilstm_kernel,
        out_shape=jax.ShapeDtypeStruct((1, L), jnp.float32),
    )(emb_bi, wx, bx, whh, wlin, blin)


def _reference_forward(x, params):
    """Pure-JAX reference (mirrors the PyTorch forward) for validation."""
    emb = params["embedding"][x[0]].astype(jnp.float32)   # (S, E)
    S, E = emb.shape
    H = E // 2

    def run_dir(seq, w_ih, w_hh, b_ih, b_hh):
        h = jnp.zeros((H,), jnp.float32)
        c = jnp.zeros((H,), jnp.float32)
        for t in range(seq.shape[0]):
            g = w_ih @ seq[t] + b_ih + w_hh @ h + b_hh
            i = jax.nn.sigmoid(g[0 * H:1 * H])
            f = jax.nn.sigmoid(g[1 * H:2 * H])
            gg = jnp.tanh(g[2 * H:3 * H])
            o = jax.nn.sigmoid(g[3 * H:4 * H])
            c = f * c + i * gg
            h = o * jnp.tanh(c)
        return h

    h_fwd = run_dir(emb, params["w_ih_f"], params["w_hh_f"],
                    params["b_ih_f"], params["b_hh_f"])
    h_bwd = run_dir(emb[::-1], params["w_ih_b"], params["w_hh_b"],
                    params["b_ih_b"], params["b_hh_b"])
    feat = jnp.concatenate([h_bwd, h_fwd])[None, :]         # (1, E)
    logits = feat @ params["w_lin"].T + params["b_lin"]
    return jax.nn.log_softmax(logits, axis=-1)


def init_params(key, vocab_size, embedding_dim, label_size):
    H = embedding_dim // 2
    ks = jax.random.split(key, 12)
    u = lambda k, shape, s: jax.random.uniform(k, shape, jnp.float32, -s, s)
    s_lstm = 1.0 / jnp.sqrt(H)
    s_lin = 1.0 / jnp.sqrt(embedding_dim)
    return {
        "embedding": jax.random.normal(ks[0], (vocab_size, embedding_dim),
                                       jnp.float32),
        "w_ih_f": u(ks[1], (4 * H, embedding_dim), s_lstm),
        "w_hh_f": u(ks[2], (4 * H, H), s_lstm),
        "b_ih_f": u(ks[3], (4 * H,), s_lstm),
        "b_hh_f": u(ks[4], (4 * H,), s_lstm),
        "w_ih_b": u(ks[5], (4 * H, embedding_dim), s_lstm),
        "w_hh_b": u(ks[6], (4 * H, H), s_lstm),
        "b_ih_b": u(ks[7], (4 * H,), s_lstm),
        "b_hh_b": u(ks[8], (4 * H,), s_lstm),
        "w_lin": u(ks[9], (label_size, embedding_dim), s_lin),
        "b_lin": u(ks[10], (label_size,), s_lin),
    }


if __name__ == "__main__":
    VOCAB, EMB, LABELS, SEQ = 50, 32, 8, 8   # hidden = EMB // 2 = 16

    key = jax.random.PRNGKey(0)
    k_par, k_tok = jax.random.split(key)
    params = init_params(k_par, VOCAB, EMB, LABELS)
    x = jax.random.randint(k_tok, (1, SEQ), 0, VOCAB, dtype=jnp.int32)

    out = bilstm_classifier_forward(x, params)
    out = jax.block_until_ready(out)

    ref = jax.block_until_ready(_reference_forward(x, params))
    assert out.shape == (1, LABELS)
    assert jnp.allclose(out, ref, rtol=2e-3, atol=2e-3), (out, ref)

    print("KERNEL_OK")
</pallas_src>

<mosaic_0001>
module attributes {stable_mosaic.version = 11 : i64} {
  func.func @_bilstm_kernel(%arg0: memref<8x64xf32, #tpu.memory_space<vmem>>, %arg1: memref<64x128xf32, #tpu.memory_space<vmem>>, %arg2: memref<1x128xf32, #tpu.memory_space<vmem>>, %arg3: memref<32x128xf32, #tpu.memory_space<vmem>>, %arg4: memref<32x8xf32, #tpu.memory_space<vmem>>, %arg5: memref<1x8xf32, #tpu.memory_space<vmem>>, %arg6: memref<1x8xf32, #tpu.memory_space<vmem>>) attributes {dimension_semantics = [], scalar_prefetch = 0 : i64, scratch_operands = 0 : i64, tpu.core_type = #tpu.core_type<tc>} {
    %c0 = arith.constant 0 : index
    %c0_0 = arith.constant 0 : index
    %0 = vector.load %arg0[%c0, %c0_0] : memref<8x64xf32, #tpu.memory_space<vmem>>, vector<8x64xf32>
    %c0_1 = arith.constant 0 : index
    %c0_2 = arith.constant 0 : index
    %1 = vector.load %arg1[%c0_1, %c0_2] : memref<64x128xf32, #tpu.memory_space<vmem>>, vector<64x128xf32>
    %cst = arith.constant dense<0.000000e+00> : vector<8x128xf32>
    %2 = tpu.matmul %0, %1, %cst {dimension_numbers = #tpu.dot_dimension_numbers<[1], [0], [0], [1], [0, 0, 1, 1], [], []>} : vector<8x64xf32>, vector<64x128xf32>, vector<8x128xf32> -> vector<8x128xf32>
    %c0_3 = arith.constant 0 : index
    %c0_4 = arith.constant 0 : index
    %3 = vector.load %arg2[%c0_3, %c0_4] : memref<1x128xf32, #tpu.memory_space<vmem>>, vector<1x128xf32>
    %4 = vector.broadcast %3 : vector<1x128xf32> to vector<8x128xf32>
    %5 = arith.addf %2, %4 : vector<8x128xf32>
    %cst_5 = arith.constant 0.000000e+00 : f32
    %6 = vector.broadcast %cst_5 : f32 to vector<1x32xf32>
    %cst_6 = arith.constant 0.000000e+00 : f32
    %7 = vector.broadcast %cst_6 : f32 to vector<1x32xf32>
    %c0_7 = arith.constant 0 : index
    %c0_8 = arith.constant 0 : index
    %8 = vector.load %arg3[%c0_7, %c0_8] : memref<32x128xf32, #tpu.memory_space<vmem>>, vector<32x128xf32>
    %cst_9 = arith.constant dense<0.000000e+00> : vector<1x128xf32>
    %9 = tpu.matmul %6, %8, %cst_9 {dimension_numbers = #tpu.dot_dimension_numbers<[1], [0], [0], [1], [0, 0, 1, 1], [], []>} : vector<1x32xf32>, vector<32x128xf32>, vector<1x128xf32> -> vector<1x128xf32>
    %10 = vector.extract_strided_slice %5 {offsets = [0, 0], sizes = [1, 128], strides = [1, 1]} : vector<8x128xf32> to vector<1x128xf32>
    %11 = arith.addf %9, %10 : vector<1x128xf32>
    %12 = vector.extract_strided_slice %11 {offsets = [0, 0], sizes = [1, 96], strides = [1, 1]} : vector<1x128xf32> to vector<1x96xf32>
    %13 = arith.negf %12 : vector<1x96xf32>
    %14 = math.exp %13 : vector<1x96xf32>
    %cst_10 = arith.constant 1.000000e+00 : f32
    %15 = vector.broadcast %cst_10 : f32 to vector<1x96xf32>
    %16 = arith.addf %15, %14 : vector<1x96xf32>
    %17 = arith.divf %15, %16 : vector<1x96xf32>
    %18 = vector.extract_strided_slice %11 {offsets = [0, 96], sizes = [1, 32], strides = [1, 1]} : vector<1x128xf32> to vector<1x32xf32>
    %19 = math.tanh %18 : vector<1x32xf32>
    %20 = vector.extract_strided_slice %17 {offsets = [0, 0], sizes = [1, 32], strides = [1, 1]} : vector<1x96xf32> to vector<1x32xf32>
    %21 = vector.extract_strided_slice %17 {offsets = [0, 32], sizes = [1, 32], strides = [1, 1]} : vector<1x96xf32> to vector<1x32xf32>
    %22 = vector.extract_strided_slice %17 {offsets = [0, 64], sizes = [1, 32], strides = [1, 1]} : vector<1x96xf32> to vector<1x32xf32>
    %23 = arith.mulf %21, %7 : vector<1x32xf32>
    %24 = arith.mulf %20, %19 : vector<1x32xf32>
    %25 = arith.addf %23, %24 : vector<1x32xf32>
    %26 = math.tanh %25 : vector<1x32xf32>
    %27 = arith.mulf %22, %26 : vector<1x32xf32>
    %c0_11 = arith.constant 0 : index
    %c0_12 = arith.constant 0 : index
    %28 = vector.load %arg3[%c0_11, %c0_12] : memref<32x128xf32, #tpu.memory_space<vmem>>, vector<32x128xf32>
    %cst_13 = arith.constant dense<0.000000e+00> : vector<1x128xf32>
    %29 = tpu.matmul %27, %28, %cst_13 {dimension_numbers = #tpu.dot_dimension_numbers<[1], [0], [0], [1], [0, 0, 1, 1], [], []>} : vector<1x32xf32>, vector<32x128xf32>, vector<1x128xf32> -> vector<1x128xf32>
    %30 = vector.extract_strided_slice %5 {offsets = [1, 0], sizes = [1, 128], strides = [1, 1]} : vector<8x128xf32> to vector<1x128xf32>
    %31 = arith.addf %29, %30 : vector<1x128xf32>
    %32 = vector.extract_strided_slice %31 {offsets = [0, 0], sizes = [1, 96], strides = [1, 1]} : vector<1x128xf32> to vector<1x96xf32>
    %33 = arith.negf %32 : vector<1x96xf32>
    %34 = math.exp %33 : vector<1x96xf32>
    %cst_14 = arith.constant 1.000000e+00 : f32
    %35 = vector.broadcast %cst_14 : f32 to vector<1x96xf32>
    %36 = arith.addf %35, %34 : vector<1x96xf32>
    %37 = arith.divf %35, %36 : vector<1x96xf32>
    %38 = vector.extract_strided_slice %31 {offsets = [0, 96], sizes = [1, 32], strides = [1, 1]} : vector<1x128xf32> to vector<1x32xf32>
    %39 = math.tanh %38 : vector<1x32xf32>
    %40 = vector.extract_strided_slice %37 {offsets = [0, 0], sizes = [1, 32], strides = [1, 1]} : vector<1x96xf32> to vector<1x32xf32>
    %41 = vector.extract_strided_slice %37 {offsets = [0, 32], sizes = [1, 32], strides = [1, 1]} : vector<1x96xf32> to vector<1x32xf32>
    %42 = vector.extract_strided_slice %37 {offsets = [0, 64], sizes = [1, 32], strides = [1, 1]} : vector<1x96xf32> to vector<1x32xf32>
    %43 = arith.mulf %41, %25 : vector<1x32xf32>
    %44 = arith.mulf %40, %39 : vector<1x32xf32>
    %45 = arith.addf %43, %44 : vector<1x32xf32>
    %46 = math.tanh %45 : vector<1x32xf32>
    %47 = arith.mulf %42, %46 : vector<1x32xf32>
    %c0_15 = arith.constant 0 : index
    %c0_16 = arith.constant 0 : index
    %48 = vector.load %arg3[%c0_15, %c0_16] : memref<32x128xf32, #tpu.memory_space<vmem>>, vector<32x128xf32>
    %cst_17 = arith.constant dense<0.000000e+00> : vector<1x128xf32>
    %49 = tpu.matmul %47, %48, %cst_17 {dimension_numbers = #tpu.dot_dimension_numbers<[1], [0], [0], [1], [0, 0, 1, 1], [], []>} : vector<1x32xf32>, vector<32x128xf32>, vector<1x128xf32> -> vector<1x128xf32>
    %50 = vector.extract_strided_slice %5 {offsets = [2, 0], sizes = [1, 128], strides = [1, 1]} : vector<8x128xf32> to vector<1x128xf32>
    %51 = arith.addf %49, %50 : vector<1x128xf32>
    %52 = vector.extract_strided_slice %51 {offsets = [0, 0], sizes = [1, 96], strides = [1, 1]} : vector<1x128xf32> to vector<1x96xf32>
    %53 = arith.negf %52 : vector<1x96xf32>
    %54 = math.exp %53 : vector<1x96xf32>
    %cst_18 = arith.constant 1.000000e+00 : f32
    %55 = vector.broadcast %cst_18 : f32 to vector<1x96xf32>
    %56 = arith.addf %55, %54 : vector<1x96xf32>
    %57 = arith.divf %55, %56 : vector<1x96xf32>
    %58 = vector.extract_strided_slice %51 {offsets = [0, 96], sizes = [1, 32], strides = [1, 1]} : vector<1x128xf32> to vector<1x32xf32>
    %59 = math.tanh %58 : vector<1x32xf32>
    %60 = vector.extract_strided_slice %57 {offsets = [0, 0], sizes = [1, 32], strides = [1, 1]} : vector<1x96xf32> to vector<1x32xf32>
    %61 = vector.extract_strided_slice %57 {offsets = [0, 32], sizes = [1, 32], strides = [1, 1]} : vector<1x96xf32> to vector<1x32xf32>
    %62 = vector.extract_strided_slice %57 {offsets = [0, 64], sizes = [1, 32], strides = [1, 1]} : vector<1x96xf32> to vector<1x32xf32>
    %63 = arith.mulf %61, %45 : vector<1x32xf32>
    %64 = arith.mulf %60, %59 : vector<1x32xf32>
    %65 = arith.addf %63, %64 : vector<1x32xf32>
    %66 = math.tanh %65 : vector<1x32xf32>
    %67 = arith.mulf %62, %66 : vector<1x32xf32>
    %c0_19 = arith.constant 0 : index
    %c0_20 = arith.constant 0 : index
    %68 = vector.load %arg3[%c0_19, %c0_20] : memref<32x128xf32, #tpu.memory_space<vmem>>, vector<32x128xf32>
    %cst_21 = arith.constant dense<0.000000e+00> : vector<1x128xf32>
    %69 = tpu.matmul %67, %68, %cst_21 {dimension_numbers = #tpu.dot_dimension_numbers<[1], [0], [0], [1], [0, 0, 1, 1], [], []>} : vector<1x32xf32>, vector<32x128xf32>, vector<1x128xf32> -> vector<1x128xf32>
    %70 = vector.extract_strided_slice %5 {offsets = [3, 0], sizes = [1, 128], strides = [1, 1]} : vector<8x128xf32> to vector<1x128xf32>
    %71 = arith.addf %69, %70 : vector<1x128xf32>
    %72 = vector.extract_strided_slice %71 {offsets = [0, 0], sizes = [1, 96], strides = [1, 1]} : vector<1x128xf32> to vector<1x96xf32>
    %73 = arith.negf %72 : vector<1x96xf32>
    %74 = math.exp %73 : vector<1x96xf32>
    %cst_22 = arith.constant 1.000000e+00 : f32
    %75 = vector.broadcast %cst_22 : f32 to vector<1x96xf32>
    %76 = arith.addf %75, %74 : vector<1x96xf32>
    %77 = arith.divf %75, %76 : vector<1x96xf32>
    %78 = vector.extract_strided_slice %71 {offsets = [0, 96], sizes = [1, 32], strides = [1, 1]} : vector<1x128xf32> to vector<1x32xf32>
    %79 = math.tanh %78 : vector<1x32xf32>
    %80 = vector.extract_strided_slice %77 {offsets = [0, 0], sizes = [1, 32], strides = [1, 1]} : vector<1x96xf32> to vector<1x32xf32>
    %81 = vector.extract_strided_slice %77 {offsets = [0, 32], sizes = [1, 32], strides = [1, 1]} : vector<1x96xf32> to vector<1x32xf32>
    %82 = vector.extract_strided_slice %77 {offsets = [0, 64], sizes = [1, 32], strides = [1, 1]} : vector<1x96xf32> to vector<1x32xf32>
    %83 = arith.mulf %81, %65 : vector<1x32xf32>
    %84 = arith.mulf %80, %79 : vector<1x32xf32>
    %85 = arith.addf %83, %84 : vector<1x32xf32>
    %86 = math.tanh %85 : vector<1x32xf32>
    %87 = arith.mulf %82, %86 : vector<1x32xf32>
    %c0_23 = arith.constant 0 : index
    %c0_24 = arith.constant 0 : index
    %88 = vector.load %arg3[%c0_23, %c0_24] : memref<32x128xf32, #tpu.memory_space<vmem>>, vector<32x128xf32>
    %cst_25 = arith.constant dense<0.000000e+00> : vector<1x128xf32>
    %89 = tpu.matmul %87, %88, %cst_25 {dimension_numbers = #tpu.dot_dimension_numbers<[1], [0], [0], [1], [0, 0, 1, 1], [], []>} : vector<1x32xf32>, vector<32x128xf32>, vector<1x128xf32> -> vector<1x128xf32>
    %90 = vector.extract_strided_slice %5 {offsets = [4, 0], sizes = [1, 128], strides = [1, 1]} : vector<8x128xf32> to vector<1x128xf32>
    %91 = arith.addf %89, %90 : vector<1x128xf32>
    %92 = vector.extract_strided_slice %91 {offsets = [0, 0], sizes = [1, 96], strides = [1, 1]} : vector<1x128xf32> to vector<1x96xf32>
    %93 = arith.negf %92 : vector<1x96xf32>
    %94 = math.exp %93 : vector<1x96xf32>
    %cst_26 = arith.constant 1.000000e+00 : f32
    %95 = vector.broadcast %cst_26 : f32 to vector<1x96xf32>
    %96 = arith.addf %95, %94 : vector<1x96xf32>
    %97 = arith.divf %95, %96 : vector<1x96xf32>
    %98 = vector.extract_strided_slice %91 {offsets = [0, 96], sizes = [1, 32], strides = [1, 1]} : vector<1x128xf32> to vector<1x32xf32>
    %99 = math.tanh %98 : vector<1x32xf32>
    %100 = vector.extract_strided_slice %97 {offsets = [0, 0], sizes = [1, 32], strides = [1, 1]} : vector<1x96xf32> to vector<1x32xf32>
    %101 = vector.extract_strided_slice %97 {offsets = [0, 32], sizes = [1, 32], strides = [1, 1]} : vector<1x96xf32> to vector<1x32xf32>
    %102 = vector.extract_strided_slice %97 {offsets = [0, 64], sizes = [1, 32], strides = [1, 1]} : vector<1x96xf32> to vector<1x32xf32>
    %103 = arith.mulf %101, %85 : vector<1x32xf32>
    %104 = arith.mulf %100, %99 : vector<1x32xf32>
    %105 = arith.addf %103, %104 : vector<1x32xf32>
    %106 = math.tanh %105 : vector<1x32xf32>
    %107 = arith.mulf %102, %106 : vector<1x32xf32>
    %c0_27 = arith.constant 0 : index
    %c0_28 = arith.constant 0 : index
    %108 = vector.load %arg3[%c0_27, %c0_28] : memref<32x128xf32, #tpu.memory_space<vmem>>, vector<32x128xf32>
    %cst_29 = arith.constant dense<0.000000e+00> : vector<1x128xf32>
    %109 = tpu.matmul %107, %108, %cst_29 {dimension_numbers = #tpu.dot_dimension_numbers<[1], [0], [0], [1], [0, 0, 1, 1], [], []>} : vector<1x32xf32>, vector<32x128xf32>, vector<1x128xf32> -> vector<1x128xf32>
    %110 = vector.extract_strided_slice %5 {offsets = [5, 0], sizes = [1, 128], strides = [1, 1]} : vector<8x128xf32> to vector<1x128xf32>
    %111 = arith.addf %109, %110 : vector<1x128xf32>
    %112 = vector.extract_strided_slice %111 {offsets = [0, 0], sizes = [1, 96], strides = [1, 1]} : vector<1x128xf32> to vector<1x96xf32>
    %113 = arith.negf %112 : vector<1x96xf32>
    %114 = math.exp %113 : vector<1x96xf32>
    %cst_30 = arith.constant 1.000000e+00 : f32
    %115 = vector.broadcast %cst_30 : f32 to vector<1x96xf32>
    %116 = arith.addf %115, %114 : vector<1x96xf32>
    %117 = arith.divf %115, %116 : vector<1x96xf32>
    %118 = vector.extract_strided_slice %111 {offsets = [0, 96], sizes = [1, 32], strides = [1, 1]} : vector<1x128xf32> to vector<1x32xf32>
    %119 = math.tanh %118 : vector<1x32xf32>
    %120 = vector.extract_strided_slice %117 {offsets = [0, 0], sizes = [1, 32], strides = [1, 1]} : vector<1x96xf32> to vector<1x32xf32>
    %121 = vector.extract_strided_slice %117 {offsets = [0, 32], sizes = [1, 32], strides = [1, 1]} : vector<1x96xf32> to vector<1x32xf32>
    %122 = vector.extract_strided_slice %117 {offsets = [0, 64], sizes = [1, 32], strides = [1, 1]} : vector<1x96xf32> to vector<1x32xf32>
    %123 = arith.mulf %121, %105 : vector<1x32xf32>
    %124 = arith.mulf %120, %119 : vector<1x32xf32>
    %125 = arith.addf %123, %124 : vector<1x32xf32>
    %126 = math.tanh %125 : vector<1x32xf32>
    %127 = arith.mulf %122, %126 : vector<1x32xf32>
    %c0_31 = arith.constant 0 : index
    %c0_32 = arith.constant 0 : index
    %128 = vector.load %arg3[%c0_31, %c0_32] : memref<32x128xf32, #tpu.memory_space<vmem>>, vector<32x128xf32>
    %cst_33 = arith.constant dense<0.000000e+00> : vector<1x128xf32>
    %129 = tpu.matmul %127, %128, %cst_33 {dimension_numbers = #tpu.dot_dimension_numbers<[1], [0], [0], [1], [0, 0, 1, 1], [], []>} : vector<1x32xf32>, vector<32x128xf32>, vector<1x128xf32> -> vector<1x128xf32>
    %130 = vector.extract_strided_slice %5 {offsets = [6, 0], sizes = [1, 128], strides = [1, 1]} : vector<8x128xf32> to vector<1x128xf32>
    %131 = arith.addf %129, %130 : vector<1x128xf32>
    %132 = vector.extract_strided_slice %131 {offsets = [0, 0], sizes = [1, 96], strides = [1, 1]} : vector<1x128xf32> to vector<1x96xf32>
    %133 = arith.negf %132 : vector<1x96xf32>
    %134 = math.exp %133 : vector<1x96xf32>
    %cst_34 = arith.constant 1.000000e+00 : f32
    %135 = vector.broadcast %cst_34 : f32 to vector<1x96xf32>
    %136 = arith.addf %135, %134 : vector<1x96xf32>
    %137 = arith.divf %135, %136 : vector<1x96xf32>
    %138 = vector.extract_strided_slice %131 {offsets = [0, 96], sizes = [1, 32], strides = [1, 1]} : vector<1x128xf32> to vector<1x32xf32>
    %139 = math.tanh %138 : vector<1x32xf32>
    %140 = vector.extract_strided_slice %137 {offsets = [0, 0], sizes = [1, 32], strides = [1, 1]} : vector<1x96xf32> to vector<1x32xf32>
    %141 = vector.extract_strided_slice %137 {offsets = [0, 32], sizes = [1, 32], strides = [1, 1]} : vector<1x96xf32> to vector<1x32xf32>
    %142 = vector.extract_strided_slice %137 {offsets = [0, 64], sizes = [1, 32], strides = [1, 1]} : vector<1x96xf32> to vector<1x32xf32>
    %143 = arith.mulf %141, %125 : vector<1x32xf32>
    %144 = arith.mulf %140, %139 : vector<1x32xf32>
    %145 = arith.addf %143, %144 : vector<1x32xf32>
    %146 = math.tanh %145 : vector<1x32xf32>
    %147 = arith.mulf %142, %146 : vector<1x32xf32>
    %c0_35 = arith.constant 0 : index
    %c0_36 = arith.constant 0 : index
    %148 = vector.load %arg3[%c0_35, %c0_36] : memref<32x128xf32, #tpu.memory_space<vmem>>, vector<32x128xf32>
    %cst_37 = arith.constant dense<0.000000e+00> : vector<1x128xf32>
    %149 = tpu.matmul %147, %148, %cst_37 {dimension_numbers = #tpu.dot_dimension_numbers<[1], [0], [0], [1], [0, 0, 1, 1], [], []>} : vector<1x32xf32>, vector<32x128xf32>, vector<1x128xf32> -> vector<1x128xf32>
    %150 = vector.extract_strided_slice %5 {offsets = [7, 0], sizes = [1, 128], strides = [1, 1]} : vector<8x128xf32> to vector<1x128xf32>
    %151 = arith.addf %149, %150 : vector<1x128xf32>
    %152 = vector.extract_strided_slice %151 {offsets = [0, 0], sizes = [1, 96], strides = [1, 1]} : vector<1x128xf32> to vector<1x96xf32>
    %153 = arith.negf %152 : vector<1x96xf32>
    %154 = math.exp %153 : vector<1x96xf32>
    %cst_38 = arith.constant 1.000000e+00 : f32
    %155 = vector.broadcast %cst_38 : f32 to vector<1x96xf32>
    %156 = arith.addf %155, %154 : vector<1x96xf32>
    %157 = arith.divf %155, %156 : vector<1x96xf32>
    %158 = vector.extract_strided_slice %151 {offsets = [0, 96], sizes = [1, 32], strides = [1, 1]} : vector<1x128xf32> to vector<1x32xf32>
    %159 = math.tanh %158 : vector<1x32xf32>
    %160 = vector.extract_strided_slice %157 {offsets = [0, 0], sizes = [1, 32], strides = [1, 1]} : vector<1x96xf32> to vector<1x32xf32>
    %161 = vector.extract_strided_slice %157 {offsets = [0, 32], sizes = [1, 32], strides = [1, 1]} : vector<1x96xf32> to vector<1x32xf32>
    %162 = vector.extract_strided_slice %157 {offsets = [0, 64], sizes = [1, 32], strides = [1, 1]} : vector<1x96xf32> to vector<1x32xf32>
    %163 = arith.mulf %161, %145 : vector<1x32xf32>
    %164 = arith.mulf %160, %159 : vector<1x32xf32>
    %165 = arith.addf %163, %164 : vector<1x32xf32>
    %166 = math.tanh %165 : vector<1x32xf32>
    %167 = arith.mulf %162, %166 : vector<1x32xf32>
    %c0_39 = arith.constant 0 : index
    %c0_40 = arith.constant 0 : index
    %168 = vector.load %arg4[%c0_39, %c0_40] : memref<32x8xf32, #tpu.memory_space<vmem>>, vector<32x8xf32>
    %cst_41 = arith.constant dense<0.000000e+00> : vector<1x8xf32>
    %169 = tpu.matmul %167, %168, %cst_41 {dimension_numbers = #tpu.dot_dimension_numbers<[1], [0], [0], [1], [0, 0, 1, 1], [], []>} : vector<1x32xf32>, vector<32x8xf32>, vector<1x8xf32> -> vector<1x8xf32>
    %c0_42 = arith.constant 0 : index
    %c0_43 = arith.constant 0 : index
    %170 = vector.load %arg5[%c0_42, %c0_43] : memref<1x8xf32, #tpu.memory_space<vmem>>, vector<1x8xf32>
    %171 = arith.addf %169, %170 : vector<1x8xf32>
    %cst_44 = arith.constant dense<0xFF800000> : vector<1xf32>
    %172 = vector.multi_reduction <maximumf>, %171, %cst_44 [1] : vector<1x8xf32> to vector<1xf32>
    %173 = vector.shape_cast %172 : vector<1xf32> to vector<1x1xf32>
    %174 = vector.broadcast %173 : vector<1x1xf32> to vector<1x8xf32>
    %175 = arith.subf %171, %174 : vector<1x8xf32>
    %176 = math.exp %175 : vector<1x8xf32>
    %cst_45 = arith.constant dense<0.000000e+00> : vector<1xf32>
    %177 = vector.multi_reduction <add>, %176, %cst_45 [1] : vector<1x8xf32> to vector<1xf32>
    %178 = vector.shape_cast %177 : vector<1xf32> to vector<1x1xf32>
    %179 = math.log %178 : vector<1x1xf32>
    %180 = vector.broadcast %179 : vector<1x1xf32> to vector<1x8xf32>
    %181 = arith.subf %175, %180 : vector<1x8xf32>
    %c0_46 = arith.constant 0 : index
    %c0_47 = arith.constant 0 : index
    %182 = vector.load %arg6[%c0_46, %c0_47] : memref<1x8xf32, #tpu.memory_space<vmem>>, vector<1x8xf32>
    tpu.vector_store %arg6[%c0_46, %c0_47], %181 {strides = array<i32>} : memref<1x8xf32, #tpu.memory_space<vmem>>, vector<1x8xf32>,
    return
  }
}

</mosaic_0001>

<bundles_post_ra>
// kernel: tpu_custom_call.1
= control target key start
LH: loop header
LB: loop body
LE: loop exit
PB: predicated region body
PF: predicated region fallthrough
CT: control target
= control target key end

     0   :  { %11 = vsyncpa [#allocation3], 0  ;;  %s931_s0 = inlined_call_operand.vmem [shape: f32[8,64], index: 0, kind: input, shape index: {}]   ;;  %s932_s1 = inlined_call_operand.hbm [shape: f32[64,128], index: 1, kind: input, shape index: {}]   ;;  %s933_s2 = inlined_call_operand.vmem [shape: f32[1,128], index: 2, kind: input, shape index: {}]   ;;  %s934_s3 = inlined_call_operand.vmem [shape: f32[32,128], index: 3, kind: input, shape index: {}]   ;;  %s935_s4 = inlined_call_operand.vmem [shape: f32[32,8], index: 4, kind: input, shape index: {}]   ;;  %s936_s5 = inlined_call_operand.vmem [shape: f32[1,8], index: 5, kind: input, shape index: {}]   ;;  %s937_s6 = inlined_call_operand.hbm [shape: f32[1,8], index: 6, kind: output, shape index: {}]  }
   0x1   :  { %12 = vsyncpa [#allocation4], 0  ;;  %s19_s23 = sshll.u32 %s932_s1, 4  ;;  %s797_s24 = smov [#allocation2]   ;;  %s20_s23 = int_to_ptr.hbm [resolvable:$true] %s19_s23 }
   0x2   :  { %s21_s25 = sshll.u32 %s797_s24, 4  ;;  %s798_s26 = smov 128   ;;  %s22_s25 = int_to_ptr.vmem [resolvable:$true] %s21_s25 }
   0x3   :  { %s799_s27 = smov 8  }
   0x4   :  { %27 = dma.hbm_to_vmem [thread:$0]  %s20_s23, 1024, %s22_s25, [#allocation3], %s798_s26, %s798_s26, %s799_s27  }
   0x5   :  { %793 = dma.done.wait [#allocation3], 1024  }
   0x6   :  { %794 = vsyncadd [#allocation3], 4294966272  ;;  %v48_v0 = vld [vmem:[#allocation2 + $0x38] sm:$0xff]  ;;  %v47_v1 = vld [vmem:[#allocation2 + $0x30] sm:$0xff]  ;;  %v800_v11 = vmov 0.0   ;;  %vm53_vm0 = vcmask 523264  }
   0x7   :  { %65 = vmatpush.msra.mxu0 %v48_v0  ;;  %v46_v2 = vld [vmem:[#allocation2 + $0x28] sm:$0xff]  ;;  %v80_v3 = vld [vmem:[%s934_s3 + $0x18] sm:$0xff]  ;;  %v79_v4 = vld [vmem:[%s934_s3 + $0x10] sm:$0xff]  ;;  %s801_s13 = smov 32   ;;  %vm81_vm5 = vcmask 261120   ;;  %s642_s26 = sshll.u32 %s937_s6, 4  ;;  %s643_s26 = int_to_ptr.hbm [resolvable:$true] %s642_s26 }
   0x8   :  { %97 = vmatpush.msra.mxu1 %v80_v3  ;;  %v45_v5 = vld [vmem:[#allocation2 + $0x20] sm:$0xff]  ;;  %v78_v6 = vld [vmem:[%s934_s3 + $0x8] sm:$0xff]  ;;  %162 = vmatpush.msra.mxu2 %v80_v3  ;;  %v44_v7 = vld [vmem:[#allocation2 + $0x18] sm:$0xff] }
   0x9   :  { %66 = vmatpush.msra.mxu0 %v47_v1  ;;  %226 = vmatpush.msra.mxu3 %v80_v3  ;;  %v77_v8 = vld [vmem:[%s934_s3] sm:$0xff]  ;;  %v43_v9 = vld [vmem:[#allocation2 + $0x10] sm:$0xff]  ;;  %v42_v10 = vld [vmem:[#allocation2 + $0x8] sm:$0xff] }
   0xa   :  { %98 = vmatpush.msra.mxu1 %v79_v4  ;;  %163 = vmatpush.msra.mxu2 %v79_v4  ;;  %v41_v12 = vld [vmem:[#allocation2] sm:$0xff] }
   0xb   :  { %67 = vmatpush.msra.mxu0 %v46_v2  ;;  %227 = vmatpush.msra.mxu3 %v79_v4  ;;  %v40_v13 = vld [vmem:[%s931_s0] sm:$0xff] }
   0xc   :  { %99 = vmatpush.msra.mxu1 %v78_v6  ;;  %164 = vmatpush.msra.mxu2 %v78_v6  ;;  %v676_v14 = vld [vmem:[%s933_s2] ss:$0 sm:$0xff]  ;;  %s802_s2 = smov 64  }
   0xd   :  { %68 = vmatpush.msra.mxu0 %v45_v5  ;;  %228 = vmatpush.msra.mxu3 %v78_v6 }
   0xe   :  { %100 = vmatpush.msra.mxu1 %v77_v8  ;;  %165 = vmatpush.msra.mxu2 %v77_v8 }
   0xf   :  { %69 = vmatpush.msra.mxu0 %v44_v7  ;;  %101 = vmatmul.f32.vlgmr.msra.gmra.mxu1 %v800_v11 }
  0x10   :  { %229 = vmatpush.msra.mxu3 %v77_v8  ;;  %290 = vmatpush.msrb.mxu1 %v80_v3 }
  0x11   :  { %70 = vmatpush.msra.mxu0 %v43_v9  ;;  %354 = vmatpush.msrb.mxu2 %v80_v3 }
  0x12   :  { %418 = vmatpush.msrb.mxu3 %v80_v3  ;;  %291 = vmatpush.msrb.mxu1 %v79_v4 }
  0x13   :  { %71 = vmatpush.msra.mxu0 %v42_v10  ;;  %355 = vmatpush.msrb.mxu2 %v79_v4 }
  0x14   :  { %419 = vmatpush.msrb.mxu3 %v79_v4  ;;  %292 = vmatpush.msrb.mxu1 %v78_v6 }
  0x15   :  { %72 = vmatpush.msra.mxu0 %v41_v12  ;;  %356 = vmatpush.msrb.mxu2 %v78_v6 }
  0x16   :  { %652 = vmatmul.msk.f32.vlgmr.msra.gmra.mxu0 %vm53_vm0, %v40_v13  ;;  %420 = vmatpush.msrb.mxu3 %v78_v6 }
  0x17   :  { %293 = vmatpush.msrb.mxu1 %v77_v8  ;;  %482 = vmatpush.msrb.mxu0 %v80_v3 }
  0x18   :  { %357 = vmatpush.msrb.mxu2 %v77_v8  ;;  %421 = vmatpush.msrb.mxu3 %v77_v8 }
  0x19   :  { %483 = vmatpush.msrb.mxu0 %v79_v4  ;;  %546 = vmatpush.msra.mxu1 %v80_v3 }
  0x1b   :  { %484 = vmatpush.msrb.mxu0 %v78_v6  ;;  %547 = vmatpush.msra.mxu1 %v79_v4 }
  0x1d   :  { %485 = vmatpush.msrb.mxu0 %v77_v8  ;;  %548 = vmatpush.msra.mxu1 %v78_v6 }
  0x1f   :  { %549 = vmatpush.msra.mxu1 %v77_v8 }
  0x8c   :  { %v102_v16 = vpop.f32.mrf.mxu1 }
  0x93   :  { %v74_v15 = vpop.f32.mrf.mxu0 }
  0x94   :  { %v860_v17 = vadd.f32 %v676_v14, %v74_v15 }
  0x96   :  { %v103_v18 = vadd.f32 %v102_v16, %v860_v17  ;;  %v146_v42 = vrot.slane %v860_v17, 1  ;;  %v210_v4 = vrot.slane %v860_v17, 2 }
  0x98   :  { %677 = vtanh.f32 %v103_v18  ;;  %v653_v20 = vmul.f32 -1.442695, %v103_v18 }
  0x9a   :  { %679 = vpow2.f32 %v653_v20 }
  0x9e   :  { %v678_v19 = vpop.eup %677 }
  0x9f   :  { %127 = vrot.lane.b32.xlu0 %v678_v19, %s801_s13 }
  0xa0   :  { %v680_v21 = vpop.eup %679 }
  0xa1   :  { %v108_v22 = vadd.f32 1.0, %v680_v21 }
  0xa3   :  { %681 = vrcp.f32 %v108_v22  ;;  %v120_v28 = vand.u32 2147483648, %v108_v22  ;;  %vm114_vm2 = vweird.f32 %v108_v22  ;;  %v118_v29 = vand.u32 2147483647, %v108_v22 }
  0xa5   :  { %v121_v31 = vor.u32 1.1754944e-38, %v120_v28  ;;  %vm119_vm4 = vcmp.eq.f32.partialorder %v118_v29, 8.507059e+37 }
  0xa9   :  { %v682_v23 = vpop.eup %681 }
  0xaa   :  { %v110_v24 = vmul.f32 %v682_v23, %v108_v22  ;;  %vm115_vm1 = vweird.f32 %v682_v23 }
  0xab   :  { %vm116_vm3 = vmor %vm114_vm2, %vm115_vm1 }
  0xac   :  { %v111_v25 = vsub.f32 1.0, %v110_v24 }
  0xae   :  { %v112_v26 = vmul.f32 %v682_v23, %v111_v25 }
  0xb0   :  { %v113_v27 = vadd.f32 %v682_v23, %v112_v26 }
  0xb2   :  { %v117_v30 = vsel %vm116_vm3, %v682_v23, %v113_v27 }
  0xb3   :  { %v122_v33 = vsel %vm119_vm4, %v121_v31, %v117_v30  ;;  %v274_v31 = vrot.slane %v860_v17, 3 }
  0xb4   :  { %v125_v35 = vmul.f32 0.0, %v122_v33 }
 0x111   :  { %v128_v32 = vpop.permute.xlu0 %127 }
 0x112   :  { %v130_v34 = vmul.f32 %v128_v32, %v122_v33 }
 0x114   :  { %132 = vrot.lane.b32.xlu0 %v130_v34, %s801_s13 }
 0x186   :  { %v133_v36 = vpop.permute.xlu0 %132 }
 0x187   :  { %v135_v37 = vadd.f32 %v133_v36, %v125_v35 }
 0x189   :  { %683 = vtanh.f32 %v135_v37 }
 0x18f   :  { %v684_v38 = vpop.eup %683 }
 0x190   :  { %138 = vrot.lane.b32.xlu1 %v684_v38, %s801_s13 }
 0x202   :  { %v139_v39 = vpop.permute.xlu1 %138 }
 0x203   :  { %v141_v40 = vmul.f32 %v139_v39, %v122_v33 }
 0x205   :  { %143 = vrot.lane.b32.xlu1 %v141_v40, %s802_s2 }
 0x277   :  { %v144_v41 = vpop.permute.xlu1 %143 }
 0x278   :  { %654 = vmatmul.msk.f32.vlgmr.msra.gmra.mxu2 %vm81_vm5, %v144_v41 }
 0x2fb   :  { %v167_v43 = vpop.f32.mrf.mxu2 }
 0x2fc   :  { %v168_v44 = vadd.f32 %v167_v43, %v146_v42 }
 0x2fe   :  { %685 = vtanh.f32 %v168_v44  ;;  %v655_v46 = vmul.f32 -1.442695, %v168_v44 }
 0x300   :  { %687 = vpow2.f32 %v655_v46 }
 0x304   :  { %v686_v45 = vpop.eup %685 }
 0x305   :  { %192 = vrot.lane.b32.xlu2 %v686_v45, %s801_s13 }
 0x306   :  { %v688_v47 = vpop.eup %687 }
 0x307   :  { %v173_v48 = vadd.f32 1.0, %v688_v47 }
 0x309   :  { %689 = vrcp.f32 %v173_v48  ;;  %v185_v54 = vand.u32 2147483648, %v173_v48  ;;  %vm179_vm7 = vweird.f32 %v173_v48  ;;  %v183_v55 = vand.u32 2147483647, %v173_v48 }
 0x30b   :  { %v186_v57 = vor.u32 1.1754944e-38, %v185_v54  ;;  %vm184_vm9 = vcmp.eq.f32.partialorder %v183_v55, 8.507059e+37 }
 0x30f   :  { %v690_v49 = vpop.eup %689 }
 0x310   :  { %v175_v50 = vmul.f32 %v690_v49, %v173_v48  ;;  %vm180_vm6 = vweird.f32 %v690_v49 }
 0x311   :  { %vm181_vm8 = vmor %vm179_vm7, %vm180_vm6 }
 0x312   :  { %v176_v51 = vsub.f32 1.0, %v175_v50 }
 0x314   :  { %v177_v52 = vmul.f32 %v690_v49, %v176_v51 }
 0x316   :  { %v178_v53 = vadd.f32 %v690_v49, %v177_v52 }
 0x318   :  { %v182_v56 = vsel %vm181_vm8, %v690_v49, %v178_v53 }
 0x319   :  { %v187_v59 = vsel %vm184_vm9, %v186_v57, %v182_v56  ;;  %v338_v57 = vrot.slane %v860_v17, 4 }
 0x31a   :  { %v190_v61 = vmul.f32 %v187_v59, %v135_v37 }
 0x35f   :  { %v193_v58 = vpop.permute.xlu2 %192 }
 0x360   :  { %v195_v60 = vmul.f32 %v193_v58, %v187_v59 }
 0x362   :  { %197 = vrot.lane.b32.xlu2 %v195_v60, %s801_s13 }
 0x3bc   :  { %v198_v62 = vpop.permute.xlu2 %197 }
 0x3bd   :  { %v200_v63 = vadd.f32 %v198_v62, %v190_v61 }
 0x3bf   :  { %691 = vtanh.f32 %v200_v63 }
 0x3c5   :  { %v692_v0 = vpop.eup %691 }
 0x3c6   :  { %203 = vrot.lane.b32.xlu0 %v692_v0, %s801_s13 }
 0x438   :  { %v204_v1 = vpop.permute.xlu0 %203 }
 0x439   :  { %v206_v2 = vmul.f32 %v204_v1, %v187_v59 }
 0x43b   :  { %208 = vrot.lane.b32.xlu1 %v206_v2, %s802_s2 }
 0x4ad   :  { %v209_v3 = vpop.permute.xlu1 %208 }
 0x4ae   :  { %656 = vmatmul.msk.f32.vlgmr.msra.gmra.mxu3 %vm81_vm5, %v209_v3 }
 0x531   :  { %v231_v5 = vpop.f32.mrf.mxu3 }
 0x532   :  { %v232_v6 = vadd.f32 %v231_v5, %v210_v4 }
 0x534   :  { %693 = vtanh.f32 %v232_v6  ;;  %v657_v8 = vmul.f32 -1.442695, %v232_v6 }
 0x536   :  { %695 = vpow2.f32 %v657_v8 }
 0x53a   :  { %v694_v7 = vpop.eup %693 }
 0x53b   :  { %256 = vrot.lane.b32.xlu2 %v694_v7, %s801_s13 }
 0x53c   :  { %v696_v9 = vpop.eup %695 }
 0x53d   :  { %v237_v10 = vadd.f32 1.0, %v696_v9 }
 0x53f   :  { %697 = vrcp.f32 %v237_v10  ;;  %v249_v16 = vand.u32 2147483648, %v237_v10  ;;  %vm243_vm11 = vweird.f32 %v237_v10  ;;  %v247_v18 = vand.u32 2147483647, %v237_v10 }
 0x541   :  { %v250_v20 = vor.u32 1.1754944e-38, %v249_v16  ;;  %vm248_vm13 = vcmp.eq.f32.partialorder %v247_v18, 8.507059e+37 }
 0x545   :  { %v698_v11 = vpop.eup %697 }
 0x546   :  { %v239_v12 = vmul.f32 %v698_v11, %v237_v10  ;;  %vm244_vm10 = vweird.f32 %v698_v11 }
 0x547   :  { %vm245_vm12 = vmor %vm243_vm11, %vm244_vm10 }
 0x548   :  { %v240_v13 = vsub.f32 1.0, %v239_v12 }
 0x54a   :  { %v241_v14 = vmul.f32 %v698_v11, %v240_v13 }
 0x54c   :  { %v242_v15 = vadd.f32 %v698_v11, %v241_v14 }
 0x54e   :  { %v246_v19 = vsel %vm245_vm12, %v698_v11, %v242_v15 }
 0x54f   :  { %v251_v22 = vsel %vm248_vm13, %v250_v20, %v246_v19  ;;  %v402_v20 = vrot.slane %v860_v17, 5 }
 0x550   :  { %v254_v24 = vmul.f32 %v251_v22, %v200_v63 }
 0x595   :  { %v257_v21 = vpop.permute.xlu2 %256 }
 0x596   :  { %v259_v23 = vmul.f32 %v257_v21, %v251_v22 }
 0x598   :  { %261 = vrot.lane.b32.xlu0 %v259_v23, %s801_s13 }
 0x60a   :  { %v262_v25 = vpop.permute.xlu0 %261 }
 0x60b   :  { %v264_v26 = vadd.f32 %v262_v25, %v254_v24 }
 0x60d   :  { %699 = vtanh.f32 %v264_v26 }
 0x613   :  { %v700_v27 = vpop.eup %699 }
 0x614   :  { %267 = vrot.lane.b32.xlu1 %v700_v27, %s801_s13 }
 0x686   :  { %v268_v28 = vpop.permute.xlu1 %267 }
 0x687   :  { %v270_v29 = vmul.f32 %v268_v28, %v251_v22 }
 0x689   :  { %272 = vrot.lane.b32.xlu2 %v270_v29, %s802_s2 }
 0x6e3   :  { %v273_v30 = vpop.permute.xlu2 %272 }
 0x6e4   :  { %658 = vmatmul.msk.f32.vlgmr.msrb.gmra.mxu1 %vm81_vm5, %v273_v30 }
 0x761   :  { %v295_v32 = vpop.f32.mrf.mxu1 }
 0x762   :  { %v296_v33 = vadd.f32 %v295_v32, %v274_v31 }
 0x764   :  { %701 = vtanh.f32 %v296_v33  ;;  %v659_v35 = vmul.f32 -1.442695, %v296_v33 }
 0x766   :  { %703 = vpow2.f32 %v659_v35 }
 0x76a   :  { %v702_v34 = vpop.eup %701 }
 0x76b   :  { %320 = vrot.lane.b32.xlu0 %v702_v34, %s801_s13 }
 0x76c   :  { %v704_v36 = vpop.eup %703 }
 0x76d   :  { %v301_v37 = vadd.f32 1.0, %v704_v36 }
 0x76f   :  { %705 = vrcp.f32 %v301_v37  ;;  %v313_v43 = vand.u32 2147483648, %v301_v37  ;;  %vm307_vm15 = vweird.f32 %v301_v37  ;;  %v311_v44 = vand.u32 2147483647, %v301_v37 }
 0x771   :  { %v314_v46 = vor.u32 1.1754944e-38, %v313_v43  ;;  %vm312_vm1 = vcmp.eq.f32.partialorder %v311_v44, 8.507059e+37 }
 0x775   :  { %v706_v38 = vpop.eup %705 }
 0x776   :  { %v303_v39 = vmul.f32 %v706_v38, %v301_v37  ;;  %vm308_vm14 = vweird.f32 %v706_v38 }
 0x777   :  { %vm309_vm0 = vmor %vm307_vm15, %vm308_vm14 }
 0x778   :  { %v304_v40 = vsub.f32 1.0, %v303_v39 }
 0x77a   :  { %v305_v41 = vmul.f32 %v706_v38, %v304_v40 }
 0x77c   :  { %v306_v42 = vadd.f32 %v706_v38, %v305_v41 }
 0x77e   :  { %v310_v45 = vsel %vm309_vm0, %v706_v38, %v306_v42 }
 0x77f   :  { %v315_v48 = vsel %vm312_vm1, %v314_v46, %v310_v45  ;;  %v466_v46 = vrot.slane %v860_v17, 6 }
 0x780   :  { %v318_v50 = vmul.f32 %v315_v48, %v264_v26 }
 0x7dd   :  { %v321_v47 = vpop.permute.xlu0 %320 }
 0x7de   :  { %v323_v49 = vmul.f32 %v321_v47, %v315_v48 }
 0x7e0   :  { %325 = vrot.lane.b32.xlu1 %v323_v49, %s801_s13 }
 0x852   :  { %v326_v51 = vpop.permute.xlu1 %325 }
 0x853   :  { %v328_v52 = vadd.f32 %v326_v51, %v318_v50 }
 0x855   :  { %707 = vtanh.f32 %v328_v52 }
 0x85b   :  { %v708_v53 = vpop.eup %707 }
 0x85c   :  { %331 = vrot.lane.b32.xlu2 %v708_v53, %s801_s13 }
 0x8b6   :  { %v332_v54 = vpop.permute.xlu2 %331 }
 0x8b7   :  { %v334_v55 = vmul.f32 %v332_v54, %v315_v48 }
 0x8b9   :  { %336 = vrot.lane.b32.xlu0 %v334_v55, %s802_s2 }
 0x92b   :  { %v337_v56 = vpop.permute.xlu0 %336 }
 0x92c   :  { %660 = vmatmul.msk.f32.vlgmr.msrb.gmra.mxu2 %vm81_vm5, %v337_v56 }
 0x9af   :  { %v359_v58 = vpop.f32.mrf.mxu2 }
 0x9b0   :  { %v360_v59 = vadd.f32 %v359_v58, %v338_v57 }
 0x9b2   :  { %709 = vtanh.f32 %v360_v59  ;;  %v661_v61 = vmul.f32 -1.442695, %v360_v59 }
 0x9b4   :  { %711 = vpow2.f32 %v661_v61 }
 0x9b8   :  { %v710_v60 = vpop.eup %709 }
 0x9b9   :  { %384 = vrot.lane.b32.xlu1 %v710_v60, %s801_s13 }
 0x9ba   :  { %v712_v62 = vpop.eup %711 }
 0x9bb   :  { %v365_v63 = vadd.f32 1.0, %v712_v62 }
 0x9bd   :  { %713 = vrcp.f32 %v365_v63  ;;  %v377_v5 = vand.u32 2147483648, %v365_v63  ;;  %vm371_vm3 = vweird.f32 %v365_v63  ;;  %v375_v6 = vand.u32 2147483647, %v365_v63 }
 0x9bf   :  { %v378_v8 = vor.u32 1.1754944e-38, %v377_v5  ;;  %vm376_vm6 = vcmp.eq.f32.partialorder %v375_v6, 8.507059e+37 }
 0x9c3   :  { %v714_v0 = vpop.eup %713 }
 0x9c4   :  { %v367_v1 = vmul.f32 %v714_v0, %v365_v63  ;;  %vm372_vm2 = vweird.f32 %v714_v0 }
 0x9c5   :  { %vm373_vm4 = vmor %vm371_vm3, %vm372_vm2  ;;  %vm621_vm3 = vcmask 57344  }
 0x9c6   :  { %v368_v2 = vsub.f32 1.0, %v367_v1 }
 0x9c8   :  { %v369_v3 = vmul.f32 %v714_v0, %v368_v2 }
 0x9ca   :  { %v370_v4 = vadd.f32 %v714_v0, %v369_v3 }
 0x9cc   :  { %v374_v7 = vsel %vm373_vm4, %v714_v0, %v370_v4 }
 0x9cd   :  { %v379_v10 = vsel %vm376_vm6, %v378_v8, %v374_v7  ;;  %v530_v8 = vrot.slane %v860_v17, 7 }
 0x9ce   :  { %v382_v12 = vmul.f32 %v379_v10, %v328_v52 }
 0xa2b   :  { %v385_v9 = vpop.permute.xlu1 %384 }
 0xa2c   :  { %v387_v11 = vmul.f32 %v385_v9, %v379_v10 }
 0xa2e   :  { %389 = vrot.lane.b32.xlu2 %v387_v11, %s801_s13 }
 0xa88   :  { %v390_v13 = vpop.permute.xlu2 %389 }
 0xa89   :  { %v392_v14 = vadd.f32 %v390_v13, %v382_v12 }
 0xa8b   :  { %715 = vtanh.f32 %v392_v14 }
 0xa91   :  { %v716_v15 = vpop.eup %715 }
 0xa92   :  { %395 = vrot.lane.b32.xlu0 %v716_v15, %s801_s13 }
 0xb04   :  { %v396_v16 = vpop.permute.xlu0 %395 }
 0xb05   :  { %v398_v18 = vmul.f32 %v396_v16, %v379_v10 }
 0xb07   :  { %400 = vrot.lane.b32.xlu1 %v398_v18, %s802_s2 }
 0xb79   :  { %v401_v19 = vpop.permute.xlu1 %400 }
 0xb7a   :  { %662 = vmatmul.msk.f32.vlgmr.msrb.gmra.mxu3 %vm81_vm5, %v401_v19 }
 0xbfd   :  { %v423_v21 = vpop.f32.mrf.mxu3 }
 0xbfe   :  { %v424_v22 = vadd.f32 %v423_v21, %v402_v20 }
 0xc00   :  { %717 = vtanh.f32 %v424_v22  ;;  %v663_v24 = vmul.f32 -1.442695, %v424_v22 }
 0xc02   :  { %719 = vpow2.f32 %v663_v24 }
 0xc06   :  { %v718_v23 = vpop.eup %717 }
 0xc07   :  { %448 = vrot.lane.b32.xlu2 %v718_v23, %s801_s13 }
 0xc08   :  { %v720_v25 = vpop.eup %719 }
 0xc09   :  { %v429_v26 = vadd.f32 1.0, %v720_v25 }
 0xc0b   :  { %721 = vrcp.f32 %v429_v26  ;;  %v441_v32 = vand.u32 2147483648, %v429_v26  ;;  %vm435_vm8 = vweird.f32 %v429_v26  ;;  %v439_v33 = vand.u32 2147483647, %v429_v26 }
 0xc0d   :  { %v442_v35 = vor.u32 1.1754944e-38, %v441_v32  ;;  %vm440_vm10 = vcmp.eq.f32.partialorder %v439_v33, 8.507059e+37  ;;  %v593_v32 = vld [vmem:[%s935_s4 + $0x10] sm:$0xff]  ;;  %v592_v33 = vld [vmem:[%s935_s4 + $0x8] sm:$0xff] }
 0xc11   :  { %v722_v27 = vpop.eup %721 }
 0xc12   :  { %v431_v28 = vmul.f32 %v722_v27, %v429_v26  ;;  %vm436_vm7 = vweird.f32 %v722_v27 }
 0xc13   :  { %vm437_vm9 = vmor %vm435_vm8, %vm436_vm7 }
 0xc14   :  { %v432_v29 = vsub.f32 1.0, %v431_v28 }
 0xc16   :  { %v433_v30 = vmul.f32 %v722_v27, %v432_v29 }
 0xc18   :  { %v434_v31 = vadd.f32 %v722_v27, %v433_v30 }
 0xc1a   :  { %v438_v34 = vsel %vm437_vm9, %v722_v27, %v434_v31  ;;  %v594_v31 = vld [vmem:[%s935_s4 + $0x18] sm:$0xff] }
 0xc1b   :  { %v443_v37 = vsel %vm440_vm10, %v442_v35, %v438_v34  ;;  %613 = vmatpush.msra.mxu2 %v594_v31  ;;  %v591_v34 = vld [vmem:[%s935_s4] sm:$0xff]  ;;  %s803_s4 = smov [#allocation5]  }
 0xc1c   :  { %v446_v39 = vmul.f32 %v443_v37, %v392_v14  ;;  %s640_s24 = sshll.u32 %s803_s4, 4  ;;  %s641_s24 = int_to_ptr.vmem [resolvable:$true] %s640_s24 }
 0xc1d   :  { %614 = vmatpush.msra.mxu2 %v593_v32 }
 0xc1f   :  { %615 = vmatpush.msra.mxu2 %v592_v33 }
 0xc21   :  { %616 = vmatpush.msra.mxu2 %v591_v34 }
 0xc61   :  { %v449_v36 = vpop.permute.xlu2 %448 }
 0xc62   :  { %v451_v38 = vmul.f32 %v449_v36, %v443_v37 }
 0xc64   :  { %453 = vrot.lane.b32.xlu0 %v451_v38, %s801_s13  ;;  %v595_v38 = vld [vmem:[%s936_s5] sm:$0x1] }
 0xcd6   :  { %v454_v40 = vpop.permute.xlu0 %453 }
 0xcd7   :  { %v456_v41 = vadd.f32 %v454_v40, %v446_v39 }
 0xcd9   :  { %723 = vtanh.f32 %v456_v41 }
 0xcdf   :  { %v724_v42 = vpop.eup %723 }
 0xce0   :  { %459 = vrot.lane.b32.xlu1 %v724_v42, %s801_s13 }
 0xd52   :  { %v460_v43 = vpop.permute.xlu1 %459 }
 0xd53   :  { %v462_v44 = vmul.f32 %v460_v43, %v443_v37 }
 0xd55   :  { %464 = vrot.lane.b32.xlu2 %v462_v44, %s802_s2 }
 0xdaf   :  { %v465_v45 = vpop.permute.xlu2 %464 }
 0xdb0   :  { %664 = vmatmul.msk.f32.vlgmr.msrb.gmra.mxu0 %vm81_vm5, %v465_v45 }
 0xe2d   :  { %v487_v47 = vpop.f32.mrf.mxu0 }
 0xe2e   :  { %v488_v48 = vadd.f32 %v487_v47, %v466_v46 }
 0xe30   :  { %725 = vtanh.f32 %v488_v48  ;;  %v665_v50 = vmul.f32 -1.442695, %v488_v48 }
 0xe32   :  { %727 = vpow2.f32 %v665_v50 }
 0xe36   :  { %v726_v49 = vpop.eup %725 }
 0xe37   :  { %512 = vrot.lane.b32.xlu0 %v726_v49, %s801_s13 }
 0xe38   :  { %v728_v51 = vpop.eup %727 }
 0xe39   :  { %v493_v52 = vadd.f32 1.0, %v728_v51 }
 0xe3b   :  { %729 = vrcp.f32 %v493_v52  ;;  %v505_v58 = vand.u32 2147483648, %v493_v52  ;;  %vm499_vm12 = vweird.f32 %v493_v52  ;;  %v503_v59 = vand.u32 2147483647, %v493_v52 }
 0xe3d   :  { %v506_v61 = vor.u32 1.1754944e-38, %v505_v58  ;;  %vm504_vm14 = vcmp.eq.f32.partialorder %v503_v59, 8.507059e+37 }
 0xe41   :  { %v730_v53 = vpop.eup %729 }
 0xe42   :  { %v495_v54 = vmul.f32 %v730_v53, %v493_v52  ;;  %vm500_vm11 = vweird.f32 %v730_v53 }
 0xe43   :  { %vm501_vm13 = vmor %vm499_vm12, %vm500_vm11 }
 0xe44   :  { %v496_v55 = vsub.f32 1.0, %v495_v54 }
 0xe46   :  { %v497_v56 = vmul.f32 %v730_v53, %v496_v55 }
 0xe48   :  { %v498_v57 = vadd.f32 %v730_v53, %v497_v56 }
 0xe4a   :  { %v502_v60 = vsel %vm501_vm13, %v730_v53, %v498_v57 }
 0xe4b   :  { %v507_v63 = vsel %vm504_vm14, %v506_v61, %v502_v60 }
 0xe4c   :  { %v510_v1 = vmul.f32 %v507_v63, %v456_v41 }
 0xea9   :  { %v513_v62 = vpop.permute.xlu0 %512 }
 0xeaa   :  { %v515_v0 = vmul.f32 %v513_v62, %v507_v63 }
 0xeac   :  { %517 = vrot.lane.b32.xlu1 %v515_v0, %s801_s13 }
 0xf1e   :  { %v518_v2 = vpop.permute.xlu1 %517 }
 0xf1f   :  { %v520_v3 = vadd.f32 %v518_v2, %v510_v1 }
 0xf21   :  { %731 = vtanh.f32 %v520_v3 }
 0xf27   :  { %v732_v4 = vpop.eup %731 }
 0xf28   :  { %523 = vrot.lane.b32.xlu2 %v732_v4, %s801_s13 }
 0xf82   :  { %v524_v5 = vpop.permute.xlu2 %523 }
 0xf83   :  { %v526_v6 = vmul.f32 %v524_v5, %v507_v63 }
 0xf85   :  { %528 = vrot.lane.b32.xlu0 %v526_v6, %s802_s2 }
 0xff7   :  { %v529_v7 = vpop.permute.xlu0 %528 }
 0xff8   :  { %666 = vmatmul.msk.f32.vlgmr.msra.gmra.mxu1 %vm81_vm5, %v529_v7 }
0x1075   :  { %v551_v9 = vpop.f32.mrf.mxu1 }
0x1076   :  { %v552_v10 = vadd.f32 %v551_v9, %v530_v8 }
0x1078   :  { %733 = vtanh.f32 %v552_v10  ;;  %v667_v12 = vmul.f32 -1.442695, %v552_v10 }
0x107a   :  { %735 = vpow2.f32 %v667_v12 }
0x107e   :  { %v734_v11 = vpop.eup %733 }
0x107f   :  { %576 = vrot.lane.b32.xlu1 %v734_v11, %s801_s13 }
0x1080   :  { %v736_v13 = vpop.eup %735 }
0x1081   :  { %v557_v14 = vadd.f32 1.0, %v736_v13 }
0x1083   :  { %737 = vrcp.f32 %v557_v14  ;;  %v569_v21 = vand.u32 2147483648, %v557_v14  ;;  %vm563_vm0 = vweird.f32 %v557_v14  ;;  %v567_v17 = vand.u32 2147483647, %v557_v14 }
0x1085   :  { %v570_v23 = vor.u32 1.1754944e-38, %v569_v21  ;;  %vm568_vm2 = vcmp.eq.f32.partialorder %v567_v17, 8.507059e+37 }
0x1089   :  { %v738_v15 = vpop.eup %737 }
0x108a   :  { %v559_v16 = vmul.f32 %v738_v15, %v557_v14  ;;  %vm564_vm15 = vweird.f32 %v738_v15 }
0x108b   :  { %vm565_vm1 = vmor %vm563_vm0, %vm564_vm15 }
0x108c   :  { %v560_v18 = vsub.f32 1.0, %v559_v16 }
0x108e   :  { %v561_v19 = vmul.f32 %v738_v15, %v560_v18 }
0x1090   :  { %v562_v20 = vadd.f32 %v738_v15, %v561_v19 }
0x1092   :  { %v566_v22 = vsel %vm565_vm1, %v738_v15, %v562_v20 }
0x1093   :  { %v571_v25 = vsel %vm568_vm2, %v570_v23, %v566_v22 }
0x1094   :  { %v574_v27 = vmul.f32 %v571_v25, %v520_v3 }
0x10f1   :  { %v577_v24 = vpop.permute.xlu1 %576 }
0x10f2   :  { %v579_v26 = vmul.f32 %v577_v24, %v571_v25 }
0x10f4   :  { %581 = vrot.lane.b32.xlu2 %v579_v26, %s801_s13 }
0x114e   :  { %v582_v28 = vpop.permute.xlu2 %581 }
0x114f   :  { %v584_v29 = vadd.f32 %v582_v28, %v574_v27 }
0x1151   :  { %739 = vtanh.f32 %v584_v29 }
0x1157   :  { %v740_v30 = vpop.eup %739 }
0x1158   :  { %587 = vrot.lane.b32.xlu0 %v740_v30, %s801_s13 }
0x11ca   :  { %v588_v35 = vpop.permute.xlu0 %587 }
0x11cb   :  { %v590_v36 = vmul.f32 %v588_v35, %v571_v25 }
0x11cd   :  { %597 = vrot.lane.b32.xlu1 %v590_v36, %s802_s2 }
0x123f   :  { %v598_v37 = vpop.permute.xlu1 %597 }
0x1240   :  { %668 = vmatmul.msk.f32.vlgmr.msra.gmra.mxu2 %vm81_vm5, %v598_v37 }
0x12c3   :  { %v618_v39 = vpop.f32.mrf.mxu2 }
0x12c4   :  { %v619_v40 = vadd.f32 %v618_v39, %v595_v38 }
0x12c6   :  { %v622_v41 = vsel %vm621_vm3, %v619_v40, -inf }
0x12c7   :  { %623 = vmax.xlane.f32.xlu2 %v622_v41 }
0x133a   :  { %v624_v42 = vpop.xlane.xlu2 %623 }
0x133b   :  { %v625_v43 = vsub.f32 %v619_v40, %v624_v42 }
0x133d   :  { %v626_v44 = vmul.f32 1.442695, %v625_v43 }
0x133f   :  { %741 = vpow2.f32 %v626_v44 }
0x1345   :  { %v742_v45 = vpop.eup %741 }
0x1346   :  { %v628_v46 = vsel %vm621_vm3, %v742_v45, 0.0 }
0x1347   :  { %629 = vadd.xlane.f32.xlu0 %v628_v46 }
0x13ba   :  { %v630_v47 = vpop.xlane.xlu0 %629 }
0x13bb   :  { %743 = vlog2.f32 %v630_v47 }
0x13c1   :  { %v744_v48 = vpop.eup %743 }
0x13c2   :  { %v632_v49 = vmul.f32 0.6931472, %v744_v48 }
0x13c4   :  { %v633_v50 = vsub.f32 %v625_v43, %v632_v49 }
0x13c6   :  { %634 = vst.msk [vmem:[#allocation5] sm:$0x1] %vm621_vm3, %v633_v50 }
0x13c7   :  { %645 = dma.vmem_to_hbm [thread:$0]  %s641_s24, 16, %s643_s26, [#allocation4]  }
0x13c8   :  { %795 = dma.done.wait [#allocation4], 16  }
0x13c9   :  { %796 = vsyncadd [#allocation4], 4294967280 }
0x13ca   :  { %650 = vsyncpa [#allocation3], 1 }
0x13cb   :  { %651 = vsyncpa [#allocation4], 1 }

</bundles_post_ra>
